<compile_context>
chip_gen: v6e
topology: v6e:2x2x1
jax: 0.10.0
libtpu: 0.0.40
codegen_flags: <defaults>
</compile_context>

<pallas_src>
import jax
import jax.numpy as jnp
from jax.experimental import pallas as pl
from jax.experimental.pallas import tpu as pltpu

L_IN = 6                       # sequence length implied by fc1 (96 = 32 * 3)
C_CONV = 32                    # conv output channels
K = 3                          # conv kernel size
H1 = 64                        # fc1 hidden size
N_CLS = 3                      # output classes
N_PAD = 8                      # class axis padded to a full sublane group
F_IN = C_CONV * (L_IN // 2)    # 96
X_ROWS = 8                     # 6 input positions + ones row (bias) + zero row
TB_MAX = 2048                  # max batch (lane) tile


def _round_up(n, m):
    return ((n + m - 1) // m) * m


def _cdiv(a, b):
    return (a + b - 1) // b


def _choose_tiling(batch):
    """Pick (TB, B_pad) so TB is a multiple of 128 and grid >= 2 when B_pad >= 256."""
    b128 = _round_up(max(batch, 1), 128)
    if b128 <= 128:
        return 128, 128
    n_tiles = max(2, _cdiv(b128, TB_MAX))          # >= 2 tiles -> v7x megacore split
    tb = _round_up(_cdiv(b128, n_tiles), 128)
    return tb, n_tiles * tb


def _cnn_kernel(x_ref, wconv_ref, w1_ref, b1_ref, w2_ref, b2_ref, o_ref):
    # Conv1d(1,32,k=3,pad=1) + bias as one MXU matmul: (192, 8) @ (8, TB).
    conv_all = jnp.dot(wconv_ref[...], x_ref[...],
                       preferred_element_type=jnp.float32)          # (192, TB) f32

    # ReLU o MaxPool1d(2): rows [0:96] are even time steps, [96:192] odd ones;
    # relu(max(a, b)) == max(relu(a), relu(b)).
    flat = jnp.maximum(jnp.maximum(conv_all[:F_IN, :], conv_all[F_IN:, :]), 0.0)

    # fc1 + ReLU.  Dropout(0.5) is identity in eval mode.
    h = jnp.dot(w1_ref[...], flat.astype(jnp.bfloat16),
                preferred_element_type=jnp.float32) + b1_ref[...]
    h = jnp.maximum(h, 0.0)                                          # (64, TB)

    # fc2 (class axis padded 3 -> 8 => unmasked, lane-dense store).
    o_ref[...] = (jnp.dot(w2_ref[...], h.astype(jnp.bfloat16),
                          preferred_element_type=jnp.float32)
                  + b2_ref[...])                                     # (8, TB)


@jax.jit
def cnn_forward(x, params):
    """x: (B, 1, 6) float32 (PyTorch NCW).  Returns (B, 3) float32 logits."""
    B = x.shape[0]
    tb, b_pad = _choose_tiling(B)

    # ---- weight preparation (all tiny; runs inside the same jit) ----------
    wc = params["Wc"][:, 0, :].astype(jnp.float32)                  # (32, 3)
    bc = params["bc"].astype(jnp.float32)                           # (32,)

    # Conv-as-matmul matrix (192, 8):
    #   row r = g*96 + p*32 + c  <->  conv output at time t = 2*p + g, channel c
    #   cols 0..5 = input positions, col 6 = conv bias (x row 6 is all-ones),
    #   col 7 = 0 (x row 7 is zeros).
    wconv = jnp.zeros((2 * F_IN, X_ROWS), jnp.float32)
    for t in range(L_IN):
        g, p = t % 2, t // 2
        r0 = g * F_IN + p * C_CONV
        for k in range(K):
            j = t + k - 1                                           # padding=1
            if 0 <= j < L_IN:
                wconv = wconv.at[r0:r0 + C_CONV, j].set(wc[:, k])
        wconv = wconv.at[r0:r0 + C_CONV, L_IN].set(bc)
    wconv = wconv.astype(jnp.bfloat16)

    # fc1: PyTorch flatten order is (channel, pool_time); kernel rows are
    # (pool_time, channel):  W1_k[o, p*32 + c] = W1[o, c*3 + p].
    W1_k = (params["W1"].astype(jnp.float32)
            .reshape(H1, C_CONV, L_IN // 2).transpose(0, 2, 1)
            .reshape(H1, F_IN).astype(jnp.bfloat16))
    b1_k = params["b1"].astype(jnp.float32).reshape(H1, 1)

    # fc2 padded on the class axis (3 -> 8) with zero rows.
    W2_k = (jnp.zeros((N_PAD, H1), jnp.float32)
            .at[:N_CLS].set(params["W2"].astype(jnp.float32))
            .astype(jnp.bfloat16))
    b2_k = jnp.zeros((N_PAD, 1), jnp.float32).at[:N_CLS, 0].set(
        params["b2"].astype(jnp.float32))

    # ---- input: batch on lanes, (8, B_pad) bf16 ----------------------------
    xT = jnp.transpose(x.reshape(B, L_IN)).astype(jnp.bfloat16)     # (6, B)
    xp = jnp.concatenate(
        [xT,
         jnp.ones((1, B), jnp.bfloat16),                            # bias row
         jnp.zeros((1, B), jnp.bfloat16)],                          # pad row
        axis=0)                                                     # (8, B)
    xp = jnp.pad(xp, ((0, 0), (0, b_pad - B)))                      # (8, B_pad)

    grid = (b_pad // tb,)
    const2 = lambda i: (0, 0)

    flops = b_pad * 2 * (2 * F_IN * X_ROWS + H1 * F_IN + N_PAD * H1)
    bytes_accessed = (2 * b_pad * X_ROWS                            # x  (bf16)
                      + 4 * b_pad * N_PAD                           # out (f32)
                      + 2 * (2 * F_IN * X_ROWS + H1 * F_IN + N_PAD * H1)
                      + 4 * (H1 + N_PAD))

    out_pad = pl.pallas_call(
        _cnn_kernel,
        out_shape=jax.ShapeDtypeStruct((N_PAD, b_pad), jnp.float32),
        grid_spec=pltpu.PrefetchScalarGridSpec(
            num_scalar_prefetch=0,
            grid=grid,
            in_specs=[
                pl.BlockSpec((X_ROWS, tb), lambda i: (0, i)),       # x (streamed)
                pl.BlockSpec((2 * F_IN, X_ROWS), const2),           # conv matrix
                pl.BlockSpec((H1, F_IN), const2),                   # W1
                pl.BlockSpec((H1, 1), const2),                      # b1
                pl.BlockSpec((N_PAD, H1), const2),                  # W2 (padded)
                pl.BlockSpec((N_PAD, 1), const2),                   # b2 (padded)
            ],
            out_specs=pl.BlockSpec((N_PAD, tb), lambda i: (0, i)),
        ),
        compiler_params=pltpu.CompilerParams(
            dimension_semantics=("parallel",),
            vmem_limit_bytes=32 * 1024 * 1024,
        ),
        cost_estimate=pl.CostEstimate(
            flops=flops, transcendentals=0, bytes_accessed=bytes_accessed),
    )(xp, wconv, W1_k, b1_k, W2_k, b2_k)

    return jnp.transpose(out_pad[:N_CLS, :B])                       # (B, 3)


def init_params(key):
    ks = jax.random.split(key, 6)
    return dict(
        Wc=0.2 * jax.random.normal(ks[0], (C_CONV, 1, K), jnp.float32),
        bc=0.1 * jax.random.normal(ks[1], (C_CONV,), jnp.float32),
        W1=0.1 * jax.random.normal(ks[2], (H1, F_IN), jnp.float32),
        b1=0.1 * jax.random.normal(ks[3], (H1,), jnp.float32),
        W2=0.1 * jax.random.normal(ks[4], (N_CLS, H1), jnp.float32),
        b2=0.1 * jax.random.normal(ks[5], (N_CLS,), jnp.float32),
    )


def reference_forward(x, p):
    """Plain-JAX f32 replica of the PyTorch forward (eval mode), NCW layout."""
    B, _, L = x.shape
    xp = jnp.pad(x[:, 0, :], ((0, 0), (1, 1)))                          # (B, L+2)
    patches = jnp.stack([xp[:, k:k + L] for k in range(K)], axis=-1)    # (B, L, 3)
    conv = (jnp.einsum("btk,ck->bct", patches, p["Wc"][:, 0, :])
            + p["bc"][None, :, None])                                   # (B, 32, L)
    conv = jnp.maximum(conv, 0.0)
    pooled = conv.reshape(B, C_CONV, L // 2, 2).max(axis=-1)            # (B, 32, 3)
    flat = pooled.reshape(B, C_CONV * (L // 2))                         # (B, 96)
    h = jnp.maximum(flat @ p["W1"].T + p["b1"], 0.0)
    return h @ p["W2"].T + p["b2"]


if __name__ == "__main__":
    key = jax.random.PRNGKey(0)
    pkey, xkey = jax.random.split(key)
    params = init_params(pkey)

    B = 16
    x = jax.random.normal(xkey, (B, 1, L_IN), jnp.float32)              # PyTorch NCW input

    out = jax.block_until_ready(cnn_forward(x, params))
    ref = reference_forward(x, params)

    assert out.shape == (B, N_CLS)
    # bf16 MXU operands (f32 accumulation) -> relaxed tolerance vs. the f32 reference.
    assert jnp.allclose(out, ref, atol=2e-2, rtol=2e-2), (
        float(jnp.max(jnp.abs(out - ref))))

    print("KERNEL_OK")
</pallas_src>

<mosaic_0001>
module attributes {stable_mosaic.version = 11 : i64} {
  func.func @_cnn_kernel(%arg0: i32, %arg1: memref<8x128xbf16, #tpu.memory_space<vmem>>, %arg2: memref<192x8xbf16, #tpu.memory_space<vmem>>, %arg3: memref<64x96xbf16, #tpu.memory_space<vmem>>, %arg4: memref<64x1xf32, #tpu.memory_space<vmem>>, %arg5: memref<8x64xbf16, #tpu.memory_space<vmem>>, %arg6: memref<8x1xf32, #tpu.memory_space<vmem>>, %arg7: memref<8x128xf32, #tpu.memory_space<vmem>>) attributes {dimension_semantics = [#tpu.dimension_semantics<parallel>], iteration_bounds = array<i64: 1>, scalar_prefetch = 0 : i64, scratch_operands = 0 : i64, tpu.core_type = #tpu.core_type<tc>, window_params = [{transform_indices = @transform_0, window_bounds = array<i64: 8, 128>}, {pipeline_mode = #tpu.pipeline_mode<synchronous>, transform_indices = @transform_1, window_bounds = array<i64: 192, 8>}, {pipeline_mode = #tpu.pipeline_mode<synchronous>, transform_indices = @transform_2, window_bounds = array<i64: 64, 96>}, {pipeline_mode = #tpu.pipeline_mode<synchronous>, transform_indices = @transform_3, window_bounds = array<i64: 64, 1>}, {pipeline_mode = #tpu.pipeline_mode<synchronous>, transform_indices = @transform_4, window_bounds = array<i64: 8, 64>}, {pipeline_mode = #tpu.pipeline_mode<synchronous>, transform_indices = @transform_5, window_bounds = array<i64: 8, 1>}, {transform_indices = @transform_6, window_bounds = array<i64: 8, 128>}]} {
    %c0 = arith.constant 0 : index
    %c0_0 = arith.constant 0 : index
    %0 = vector.load %arg2[%c0, %c0_0] : memref<192x8xbf16, #tpu.memory_space<vmem>>, vector<192x8xbf16>
    %c0_1 = arith.constant 0 : index
    %c0_2 = arith.constant 0 : index
    %1 = vector.load %arg1[%c0_1, %c0_2] : memref<8x128xbf16, #tpu.memory_space<vmem>>, vector<8x128xbf16>
    %cst = arith.constant dense<0.000000e+00> : vector<192x128xf32>
    %2 = tpu.matmul %0, %1, %cst {dimension_numbers = #tpu.dot_dimension_numbers<[1], [0], [0], [1], [0, 0, 1, 1], [], []>} : vector<192x8xbf16>, vector<8x128xbf16>, vector<192x128xf32> -> vector<192x128xf32>
    %3 = vector.extract_strided_slice %2 {offsets = [0, 0], sizes = [96, 128], strides = [1, 1]} : vector<192x128xf32> to vector<96x128xf32>
    %4 = vector.extract_strided_slice %2 {offsets = [96, 0], sizes = [96, 128], strides = [1, 1]} : vector<192x128xf32> to vector<96x128xf32>
    %5 = arith.maximumf %3, %4 : vector<96x128xf32>
    %cst_3 = arith.constant 0.000000e+00 : f32
    %6 = vector.broadcast %cst_3 : f32 to vector<96x128xf32>
    %7 = arith.maximumf %5, %6 : vector<96x128xf32>
    %c0_4 = arith.constant 0 : index
    %c0_5 = arith.constant 0 : index
    %8 = vector.load %arg3[%c0_4, %c0_5] : memref<64x96xbf16, #tpu.memory_space<vmem>>, vector<64x96xbf16>
    %9 = arith.truncf %7 : vector<96x128xf32> to vector<96x128xbf16>
    %cst_6 = arith.constant dense<0.000000e+00> : vector<64x128xf32>
    %10 = tpu.matmul %8, %9, %cst_6 {dimension_numbers = #tpu.dot_dimension_numbers<[1], [0], [0], [1], [0, 0, 1, 1], [], []>} : vector<64x96xbf16>, vector<96x128xbf16>, vector<64x128xf32> -> vector<64x128xf32>
    %c0_7 = arith.constant 0 : index
    %c0_8 = arith.constant 0 : index
    %11 = vector.load %arg4[%c0_7, %c0_8] : memref<64x1xf32, #tpu.memory_space<vmem>>, vector<64x1xf32>
    %12 = vector.broadcast %11 : vector<64x1xf32> to vector<64x128xf32>
    %13 = arith.addf %10, %12 : vector<64x128xf32>
    %cst_9 = arith.constant 0.000000e+00 : f32
    %14 = vector.broadcast %cst_9 : f32 to vector<64x128xf32>
    %15 = arith.maximumf %13, %14 : vector<64x128xf32>
    %c0_10 = arith.constant 0 : index
    %c0_11 = arith.constant 0 : index
    %16 = vector.load %arg5[%c0_10, %c0_11] : memref<8x64xbf16, #tpu.memory_space<vmem>>, vector<8x64xbf16>
    %17 = arith.truncf %15 : vector<64x128xf32> to vector<64x128xbf16>
    %cst_12 = arith.constant dense<0.000000e+00> : vector<8x128xf32>
    %18 = tpu.matmul %16, %17, %cst_12 {dimension_numbers = #tpu.dot_dimension_numbers<[1], [0], [0], [1], [0, 0, 1, 1], [], []>} : vector<8x64xbf16>, vector<64x128xbf16>, vector<8x128xf32> -> vector<8x128xf32>
    %c0_13 = arith.constant 0 : index
    %c0_14 = arith.constant 0 : index
    %19 = vector.load %arg6[%c0_13, %c0_14] : memref<8x1xf32, #tpu.memory_space<vmem>>, vector<8x1xf32>
    %20 = vector.broadcast %19 : vector<8x1xf32> to vector<8x128xf32>
    %21 = arith.addf %18, %20 : vector<8x128xf32>
    %c0_15 = arith.constant 0 : index
    %c0_16 = arith.constant 0 : index
    %22 = vector.load %arg7[%c0_15, %c0_16] : memref<8x128xf32, #tpu.memory_space<vmem>>, vector<8x128xf32>
    tpu.vector_store %arg7[%c0_15, %c0_16], %21 {strides = array<i32>} : memref<8x128xf32, #tpu.memory_space<vmem>>, vector<8x128xf32>,
    return
  }
  func.func @transform_0(%arg0: i32) -> (i32, i32) {
    %c0_i32 = arith.constant 0 : i32
    %c0_i32_0 = arith.constant 0 : i32
    return %c0_i32, %arg0 : i32, i32
  }
  func.func @transform_1(%arg0: i32) -> (i32, i32) {
    %c0_i32 = arith.constant 0 : i32
    %c0_i32_0 = arith.constant 0 : i32
    %c0_i32_1 = arith.constant 0 : i32
    return %c0_i32, %c0_i32_0 : i32, i32
  }
  func.func @transform_2(%arg0: i32) -> (i32, i32) {
    %c0_i32 = arith.constant 0 : i32
    %c0_i32_0 = arith.constant 0 : i32
    %c0_i32_1 = arith.constant 0 : i32
    return %c0_i32, %c0_i32_0 : i32, i32
  }
  func.func @transform_3(%arg0: i32) -> (i32, i32) {
    %c0_i32 = arith.constant 0 : i32
    %c0_i32_0 = arith.constant 0 : i32
    %c0_i32_1 = arith.constant 0 : i32
    return %c0_i32, %c0_i32_0 : i32, i32
  }
  func.func @transform_4(%arg0: i32) -> (i32, i32) {
    %c0_i32 = arith.constant 0 : i32
    %c0_i32_0 = arith.constant 0 : i32
    %c0_i32_1 = arith.constant 0 : i32
    return %c0_i32, %c0_i32_0 : i32, i32
  }
  func.func @transform_5(%arg0: i32) -> (i32, i32) {
    %c0_i32 = arith.constant 0 : i32
    %c0_i32_0 = arith.constant 0 : i32
    %c0_i32_1 = arith.constant 0 : i32
    return %c0_i32, %c0_i32_0 : i32, i32
  }
  func.func @transform_6(%arg0: i32) -> (i32, i32) {
    %c0_i32 = arith.constant 0 : i32
    %c0_i32_0 = arith.constant 0 : i32
    return %c0_i32, %arg0 : i32, i32
  }
}

</mosaic_0001>

<bundles_post_ra>
// kernel: cnn_forward.1
= control target key start
LH: loop header
LB: loop body
LE: loop exit
PB: predicated region body
PF: predicated region fallthrough
CT: control target
= control target key end

     0   :  { %vm146_vm0 = vcmask 1043456   ;;  %vm109_vm1 = vcmask 64512   ;;  %vm385_vm2 = vcmask 785408   ;;  %v672_v15 = vmov 0   ;;  %s810_s0 = inlined_call_operand.vmem [shape: bf16[8,128], index: 0, kind: input, shape index: {}]   ;;  %s811_s1 = inlined_call_operand.vmem [shape: bf16[192,8], index: 1, kind: input, shape index: {}]   ;;  %s812_s2 = inlined_call_operand.vmem [shape: bf16[64,96], index: 2, kind: input, shape index: {}]   ;;  %s813_s3 = inlined_call_operand.vmem [shape: f32[64,1], index: 3, kind: input, shape index: {}]   ;;  %s814_s5 = inlined_call_operand.vmem [shape: f32[8,1], index: 5, kind: input, shape index: {}]   ;;  %s815_s4 = inlined_call_operand.vmem [shape: bf16[8,64], index: 4, kind: input, shape index: {}]   ;;  %s816_s6 = inlined_call_operand.vmem [shape: f32[8,128], index: 6, kind: output, shape index: {}]  }
   0x1   :  { %v48_v0 = vld [vmem:[%s810_s0] sm:$0xf]  ;;  %v657_v3 = vld [vmem:[%s811_s1 + $0x8] sm:$0xff]   ;;  %v658_v4 = vld [vmem:[%s811_s1 + $0x10] sm:$0xff]   ;;  %654 = vset.pattern.permute.xlu0 %v672_v15  ;;  %655 = vset.pattern.permute.xlu1 %v672_v15  ;;  %vm674_vm3 = vmmov 0   ;;  %vm482_vm4 = vcmask 523264  }
   0x2   :  { %650 = vmatprep.subr.msk.bf16.mxu0 %vm146_vm0, %v48_v0  ;;  %v148_v1 = vsel %vm146_vm0, %v48_v0, 0  ;;  %v656_v2 = vld [vmem:[%s811_s1] sm:$0xff]   ;;  %v659_v5 = vld [vmem:[%s811_s1 + $0x18] sm:$0xff]   ;;  %v661_v7 = vld [vmem:[%s811_s1 + $0x28] sm:$0xff]  }
   0x3   :  { %593 = vmatpush3.bf16.msra.mxu0 %v148_v1  ;;  %594 = vmatprep.mubr.msk.bf16.mxu0 %vm109_vm1, %v656_v2  ;;  %v660_v6 = vld [vmem:[%s811_s1 + $0x20] sm:$0xff]   ;;  %v662_v8 = vld [vmem:[%s811_s1 + $0x30] sm:$0xff]   ;;  %v663_v9 = vld [vmem:[%s811_s1 + $0x38] sm:$0xff]  }
   0x4   :  { %v664_v10 = vld [vmem:[%s811_s1 + $0x40] sm:$0xff]   ;;  %v665_v11 = vld [vmem:[%s811_s1 + $0x48] sm:$0xff]   ;;  %v666_v12 = vld [vmem:[%s811_s1 + $0x50] sm:$0xff]  }
   0x5   :  { %v667_v13 = vld [vmem:[%s811_s1 + $0x58] sm:$0xff]   ;;  %v668_v14 = vld [vmem:[%s812_s2] sm:$0xff]   ;;  %v323_v16 = vld [vmem:[%s813_s3 + $0x30] sm:$0xff] }
   0x6   :  { %595 = vmatmul.mubr.msk.bf16.vlgmr.msra.gmra.mxu0 %vm109_vm1, %v657_v3  ;;  %630 = vmatprep.mubr.msk.bf16.mxu1 %vm385_vm2, %v668_v14  ;;  %v321_v17 = vld [vmem:[%s813_s3 + $0x20] sm:$0xff]  ;;  %v324_v18 = vld [vmem:[%s813_s3 + $0x38] sm:$0xff]  ;;  %v322_v19 = vld [vmem:[%s813_s3 + $0x28] sm:$0xff] }
   0x7   :  { %598 = vmatprep.mubr.msk.bf16.mxu0 %vm109_vm1, %v658_v4  ;;  %357 = vperm.xlu0 %654, %v323_v16   ;;  %v319_v20 = vld [vmem:[%s813_s3 + $0x10] sm:$0xff]  ;;  %v320_v21 = vld [vmem:[%s813_s3 + $0x18] sm:$0xff]  ;;  %v317_v22 = vld [vmem:[%s813_s3] sm:$0xff] }
   0x8   :  { %347 = vperm.xlu1 %655, %v321_v17   ;;  %v318_v23 = vld [vmem:[%s813_s3 + $0x8] sm:$0xff]  ;;  %v476_v24 = vld [vmem:[%s814_s5] sm:$0xff]  ;;  %v670_v16 = vld [vmem:[%s812_s2 + $0x10] sm:$0xff]  }
   0x9   :  { %v669_v15 = vld [vmem:[%s812_s2 + $0x8] sm:$0xff]   ;;  %v671_v17 = vld [vmem:[%s812_s2 + $0x18] sm:$0xff]  }
   0xb   :  { %362 = vperm.xlu0 %654, %v324_v18   ;;  %v673_v18 = vmov 0.0  }
   0xc   :  { %352 = vperm.xlu1 %655, %v322_v19  }
   0xe   :  { %599 = vmatmul.mubr.msk.bf16.gmra.mxu0 %vm109_vm1, %v659_v5 }
   0xf   :  { %602 = vmatprep.mubr.msk.bf16.mxu0 %vm109_vm1, %v660_v6  ;;  %337 = vperm.xlu0 %654, %v319_v20  }
  0x10   :  { %342 = vperm.xlu1 %655, %v320_v21  }
  0x13   :  { %327 = vperm.xlu0 %654, %v317_v22  }
  0x14   :  { %332 = vperm.xlu1 %655, %v318_v23  }
  0x16   :  { %603 = vmatmul.mubr.msk.bf16.gmra.mxu0 %vm109_vm1, %v661_v7 }
  0x17   :  { %606 = vmatprep.mubr.msk.bf16.mxu0 %vm109_vm1, %v662_v8  ;;  %479 = vperm.xlu0 %654, %v476_v24  }
  0x1e   :  { %607 = vmatmul.mubr.msk.bf16.gmra.mxu0 %vm109_vm1, %v663_v9 }
  0x1f   :  { %610 = vmatprep.mubr.msk.bf16.mxu0 %vm109_vm1, %v664_v10 }
  0x26   :  { %611 = vmatmul.mubr.msk.bf16.gmra.mxu0 %vm109_vm1, %v665_v11 }
  0x27   :  { %614 = vmatprep.mubr.msk.bf16.mxu0 %vm109_vm1, %v666_v12 }
  0x2e   :  { %615 = vmatmul.mubr.msk.bf16.gmra.mxu0 %vm109_vm1, %v667_v13 }
  0x82   :  { %v358_v21 = vpop.permute.xlu0 %357 }
  0x83   :  { %v348_v19 = vpop.permute.xlu1 %347 }
  0x87   :  { %v353_v24 = vpop.permute.xlu1 %352 }
  0xc6   :  { %v596_v25 = vpop.f32.mrf.mxu0 }
  0xc8   :  { %v184_v26 = vpop.f32.mrf.mxu0 }
  0xca   :  { %v597_v27 = vpop.f32.mrf.mxu0 }
  0xcc   :  { %v187_v28 = vpop.f32.mrf.mxu0 }
  0xce   :  { %v600_v29 = vpop.f32.mrf.mxu0 }
  0xd0   :  { %v200_v30 = vpop.f32.mrf.mxu0 }
  0xd2   :  { %v601_v31 = vpop.f32.mrf.mxu0 }
  0xd4   :  { %v203_v32 = vpop.f32.mrf.mxu0 }
  0xd6   :  { %v604_v33 = vpop.f32.mrf.mxu0 }
  0xd8   :  { %v216_v34 = vpop.f32.mrf.mxu0 }
  0xda   :  { %v605_v35 = vpop.f32.mrf.mxu0 }
  0xdc   :  { %v219_v36 = vpop.f32.mrf.mxu0 }
  0xde   :  { %v608_v37 = vpop.f32.mrf.mxu0 }
  0xdf   :  { %v281_v4 = vmax.f32 %v596_v25, %v608_v37 }
  0xe0   :  { %v232_v38 = vpop.f32.mrf.mxu0 }
  0xe1   :  { %v293_v9 = vmax.f32 %v281_v4, 0.0  ;;  %v279_v10 = vmax.f32 %v184_v26, %v232_v38  ;;  %v363_v26 = vpop.permute.xlu0 %362 }
  0xe2   :  { %v609_v39 = vpop.f32.mrf.mxu0 }
  0xe3   :  { %v282_v1 = vmax.f32 %v597_v27, %v609_v39  ;;  %v291_v13 = vmax.f32 %v279_v10, 0.0 }
  0xe4   :  { %v235_v40 = vpop.f32.mrf.mxu0 }
  0xe5   :  { %v294_v6 = vmax.f32 %v282_v1, 0.0  ;;  %v280_v7 = vmax.f32 %v187_v28, %v235_v40 }
  0xe6   :  { %v612_v41 = vpop.f32.mrf.mxu0 }
  0xe7   :  { %v285_v56 = vmax.f32 %v600_v29, %v612_v41  ;;  %v312_v11 = vpack.c.bf16 %v294_v6, %v293_v9  ;;  %v292_v12 = vmax.f32 %v280_v7, 0.0 }
  0xe8   :  { %v248_v42 = vpop.f32.mrf.mxu0 }
  0xe9   :  { %v297_v63 = vmax.f32 %v285_v56, 0.0  ;;  %v283_v0 = vmax.f32 %v200_v30, %v248_v42  ;;  %v311_v14 = vpack.c.bf16 %v292_v12, %v291_v13  ;;  %v343_v30 = vpop.permute.xlu1 %342 }
  0xea   :  { %v613_v43 = vpop.f32.mrf.mxu0 }
  0xeb   :  { %v286_v52 = vmax.f32 %v601_v31, %v613_v43  ;;  %v295_v5 = vmax.f32 %v283_v0, 0.0 }
  0xec   :  { %v251_v44 = vpop.f32.mrf.mxu0 }
  0xed   :  { %v298_v60 = vmax.f32 %v286_v52, 0.0  ;;  %v284_v61 = vmax.f32 %v203_v32, %v251_v44  ;;  %v333_v42 = vpop.permute.xlu1 %332 }
  0xee   :  { %v616_v45 = vpop.f32.mrf.mxu0 }
  0xef   :  { %v289_v47 = vmax.f32 %v604_v33, %v616_v45  ;;  %v314_v2 = vpack.c.bf16 %v298_v60, %v297_v63  ;;  %v296_v3 = vmax.f32 %v284_v61, 0.0  ;;  %v338_v33 = vpop.permute.xlu0 %337 }
  0xf0   :  { %v264_v46 = vpop.f32.mrf.mxu0 }
  0xf1   :  { %v287_v49 = vmax.f32 %v216_v34, %v264_v46  ;;  %v301_v53 = vmax.f32 %v289_v47, 0.0  ;;  %v313_v8 = vpack.c.bf16 %v296_v3, %v295_v5 }
  0xf2   :  { %v617_v48 = vpop.f32.mrf.mxu0 }
  0xf3   :  { %v290_v50 = vmax.f32 %v605_v35, %v617_v48  ;;  %v299_v57 = vmax.f32 %v287_v49, 0.0  ;;  %v328_v45 = vpop.permute.xlu0 %327 }
  0xf4   :  { %v267_v51 = vpop.f32.mrf.mxu0 }
  0xf5   :  { %v302_v54 = vmax.f32 %v290_v50, 0.0  ;;  %v288_v55 = vmax.f32 %v219_v36, %v267_v51 }
  0xf7   :  { %v300_v58 = vmax.f32 %v288_v55, 0.0  ;;  %v316_v59 = vpack.c.bf16 %v302_v54, %v301_v53  ;;  %v471_v55 = vld [vmem:[%s815_s4] sm:$0xf]  ;;  %v480_v56 = vpop.permute.xlu0 %479 }
  0xf9   :  { %v315_v62 = vpack.c.bf16 %v300_v58, %v299_v57  ;;  %618 = vmatprep.subr.bf16.mxu1 %v316_v59 }
  0xfa   :  { %619 = vmatpush3.bf16.msra.mxu1 %v316_v59 }
  0xfb   :  { %620 = vmatprep.subr.bf16.mxu1 %v315_v62 }
  0xfe   :  { %621 = vmatpush3.bf16.msra.mxu1 %v315_v62 }
  0xff   :  { %622 = vmatprep.subr.bf16.mxu1 %v314_v2 }
 0x102   :  { %623 = vmatpush3.bf16.msra.mxu1 %v314_v2 }
 0x103   :  { %624 = vmatprep.subr.bf16.mxu1 %v313_v8 }
 0x106   :  { %625 = vmatpush3.bf16.msra.mxu1 %v313_v8 }
 0x107   :  { %626 = vmatprep.subr.bf16.mxu1 %v312_v11 }
 0x10a   :  { %627 = vmatpush3.bf16.msra.mxu1 %v312_v11 }
 0x10b   :  { %628 = vmatprep.subr.bf16.mxu1 %v311_v14 }
 0x10e   :  { %629 = vmatpush3.bf16.msra.mxu1 %v311_v14 }
 0x10f   :  { %638 = vmatprep.subr.bf16.mxu1 %v673_v18 }
 0x111   :  { %631 = vmatmul.mubr.msk.bf16.vlgmr.msra.gmra.mxu1 %vm385_vm2, %v669_v15 }
 0x112   :  { %634 = vmatprep.mubr.msk.bf16.mxu1 %vm385_vm2, %v670_v16 }
 0x119   :  { %635 = vmatmul.mubr.msk.bf16.gmra.mxu1 %vm385_vm2, %v671_v17 }
 0x11a   :  { %646 = vmatprep.mubr.msk.bf16.mxu1 %vm674_vm3, %v673_v18 }
 0x1d1   :  { %v632_v20 = vpop.f32.mrf.mxu1 }
 0x1d2   :  { %v441_v43 = vadd.f32 %v632_v20, %v338_v33 }
 0x1d3   :  { %v432_v22 = vpop.f32.mrf.mxu1 }
 0x1d4   :  { %v465_v49 = vmax.f32 %v441_v43, 0.0  ;;  %v433_v50 = vadd.f32 %v432_v22, %v328_v45 }
 0x1d5   :  { %v633_v23 = vpop.f32.mrf.mxu1 }
 0x1d6   :  { %v444_v39 = vadd.f32 %v633_v23, %v343_v30  ;;  %v463_v53 = vmax.f32 %v433_v50, 0.0 }
 0x1d7   :  { %v435_v25 = vpop.f32.mrf.mxu1 }
 0x1d8   :  { %v466_v46 = vmax.f32 %v444_v39, 0.0  ;;  %v436_v47 = vadd.f32 %v435_v25, %v333_v42 }
 0x1d9   :  { %v636_v27 = vpop.f32.mrf.mxu1 }
 0x1da   :  { %v457_v29 = vadd.f32 %v636_v27, %v358_v21  ;;  %v473_v51 = vpack.c.bf16 %v466_v46, %v465_v49  ;;  %v464_v52 = vmax.f32 %v436_v47, 0.0 }
 0x1db   :  { %v448_v28 = vpop.f32.mrf.mxu1 }
 0x1dc   :  { %v469_v35 = vmax.f32 %v457_v29, 0.0  ;;  %v449_v36 = vadd.f32 %v448_v28, %v348_v19  ;;  %v472_v54 = vpack.c.bf16 %v464_v52, %v463_v53 }
 0x1dd   :  { %v637_v31 = vpop.f32.mrf.mxu1 }
 0x1de   :  { %v460_v32 = vadd.f32 %v637_v31, %v363_v26  ;;  %v467_v44 = vmax.f32 %v449_v36, 0.0 }
 0x1df   :  { %v451_v34 = vpop.f32.mrf.mxu1 }
 0x1e0   :  { %v470_v37 = vmax.f32 %v460_v32, 0.0  ;;  %v452_v38 = vadd.f32 %v451_v34, %v353_v24 }
 0x1e2   :  { %v475_v40 = vpack.c.bf16 %v470_v37, %v469_v35  ;;  %v468_v41 = vmax.f32 %v452_v38, 0.0 }
 0x1e4   :  { %639 = vmatpush3.bf16.msra.mxu1 %v475_v40  ;;  %v474_v48 = vpack.c.bf16 %v468_v41, %v467_v44 }
 0x1e5   :  { %640 = vmatprep.subr.bf16.mxu1 %v673_v18 }
 0x1e8   :  { %641 = vmatpush3.bf16.msra.mxu1 %v474_v48 }
 0x1e9   :  { %642 = vmatprep.subr.bf16.mxu1 %v673_v18 }
 0x1ec   :  { %643 = vmatpush3.bf16.msra.mxu1 %v473_v51 }
 0x1ed   :  { %644 = vmatprep.subr.bf16.mxu1 %v673_v18 }
 0x1f0   :  { %645 = vmatpush3.bf16.msra.mxu1 %v472_v54 }
 0x1f3   :  { %647 = vmatmul.mubr.msk.bf16.vlgmr.msra.gmra.mxu1 %vm482_vm4, %v471_v55 }
 0x2b3   :  { %v520_v57 = vpop.f32.mrf.mxu1 }
 0x2b4   :  { %v521_v58 = vadd.f32 %v520_v57, %v480_v56 }
 0x2b5   :  { %v648_v59 = vpop.f32.mrf.mxu1 }
 0x2b6   :  { %526 = vst [vmem:[%s816_s6] sm:$0xff] %v521_v58 }
 0x2b7   :  { %v523_v60 = vpop.f32.mrf.mxu1 }
 0x2b9   :  { %v649_v61 = vpop.f32.mrf.mxu1 }

</bundles_post_ra>
